<compile_context>
chip_gen: v6e
topology: v6e:2x2x1
jax: 0.10.0
libtpu: 0.0.40
codegen_flags: <defaults>
</compile_context>

<pallas_src>
import functools

import jax
import jax.numpy as jnp
from jax.experimental import pallas as pl
from jax.experimental.pallas import tpu as pltpu

_LANES = 128
_SUBLANES = 8


def _round_up(x, m):
    return ((x + m - 1) // m) * m


def _device_defaults():
    """Per-generation defaults: (num_splits, target bytes per input block).

    v7x: 2 TensorCores + 3.2 TB/s HBM -> split the grid and use 4 MiB blocks
    (16 MiB double-buffered with 2 inputs, fits the 32 MiB scoped default).
    v5e/v6e: 1 TC; 2 MiB blocks (8 MiB total) fit v5e's 16 MiB scoped-VMEM
    default and are already ~85-90% of their HBM roofline.
    """
    try:
        kind = jax.devices()[0].device_kind.lower()
    except Exception:  # defensive: never fail just because of introspection
        kind = ""
    if "v7" in kind:
        return 2, 4 * 1024 * 1024
    return 1, 2 * 1024 * 1024


def _mse_partial_kernel(a_ref, b_ref, out_ref, *, total_rows):
    s = pl.program_id(0)          # split axis ("parallel"; one per TC on v7x)
    t = pl.program_id(1)          # block-within-split axis ("arbitrary")
    nt = pl.num_programs(1)
    blk_rows = a_ref.shape[0]

    @pl.when(t == 0)
    def _():
        out_ref[...] = jnp.zeros_like(out_ref)

    # f32 math regardless of input dtype.
    d = a_ref[...].astype(jnp.float32) - b_ref[...].astype(jnp.float32)
    sq = d * d

    row0 = (s * nt + t) * blk_rows
    full_block = row0 + blk_rows <= total_rows

    # Steady-state path: no iota/compare/select, keeps the kernel purely
    # HBM-bound (the VALU slot is the v7x risk otherwise).
    @pl.when(full_block)
    def _():
        out_ref[...] += sq.reshape(blk_rows // _SUBLANES, _SUBLANES, _LANES).sum(axis=0)

    # Ragged last block / clamped out-of-range duplicate blocks only: mask
    # rows past the logical end. jnp.where selects, so garbage (NaN/Inf) in
    # out-of-range rows cannot propagate into the accumulator.
    @pl.when(jnp.logical_not(full_block))
    def _():
        row_idx = row0 + jax.lax.broadcasted_iota(jnp.int32, sq.shape, 0)
        masked = jnp.where(row_idx < total_rows, sq, 0.0)
        out_ref[...] += masked.reshape(blk_rows // _SUBLANES, _SUBLANES, _LANES).sum(axis=0)


def self_supervised_estimator_loss(l_hat, l, *, tile_rows=None, num_splits=None):
    """Returns {'loss': scalar} — same semantics as the PyTorch module."""
    assert l_hat.shape == l.shape, "l_hat and l must have the same shape"

    a = jnp.ravel(l_hat)   # free (pure reshape) for contiguous arrays
    b = jnp.ravel(l)
    n = a.shape[0]

    itemsize = max(jnp.dtype(l_hat.dtype).itemsize, jnp.dtype(l.dtype).itemsize)
    # Sublane alignment for the row block dim: 8 for 32-bit, 16 for 16-bit,
    # 32 for 8-bit packed dtypes.
    row_align = max(_SUBLANES, 32 // itemsize)

    dev_splits, block_bytes = _device_defaults()
    if num_splits is None:
        num_splits = dev_splits
    if tile_rows is None:
        tile_rows = max(row_align,
                        (block_bytes // (_LANES * itemsize)) // row_align * row_align)

    rows = n // _LANES                 # aligned-prefix rows (no padding)
    tail = n - rows * _LANES           # < 128 leftover elements

    main_sum = jnp.float32(0.0)
    if rows > 0:
        if tail:
            # Ragged case: only the aligned prefix goes through the kernel
            # (at worst one prefix-slice copy — never a full-array pad).
            a2 = a[: rows * _LANES].reshape(rows, _LANES)
            b2 = b[: rows * _LANES].reshape(rows, _LANES)
        else:
            a2 = a.reshape(rows, _LANES)
            b2 = b.reshape(rows, _LANES)

        blk_rows = min(_round_up(tile_rows, row_align), _round_up(rows, row_align))
        total_blocks = -(-rows // blk_rows)
        n_splits = max(1, min(num_splits, total_blocks))
        if n_splits > 1 and total_blocks % n_splits != 0:
            # Best effort: slightly smaller blocks so the grid splits evenly
            # and no TC ever DMAs a redundant clamped duplicate block.
            even_blocks = _round_up(total_blocks, n_splits)
            alt_rows = _round_up(-(-rows // even_blocks), row_align)
            alt_blocks = -(-rows // alt_rows)
            if alt_blocks % n_splits == 0:
                blk_rows, total_blocks = alt_rows, alt_blocks
        blocks_per_split = -(-total_blocks // n_splits)

        def in_map(si, ti):
            # Clamp so every DMA stays in bounds; the kernel's masked branch
            # zeroes any logically out-of-range (clamped) block.
            return (jnp.minimum(si * blocks_per_split + ti, total_blocks - 1), 0)

        def out_map(si, ti):
            return (si, 0)

        kernel = functools.partial(_mse_partial_kernel, total_rows=rows)

        cost = pl.CostEstimate(
            flops=3 * rows * _LANES,
            transcendentals=0,
            bytes_accessed=2 * rows * _LANES * itemsize
            + n_splits * _SUBLANES * _LANES * 4,
        )

        partials = pl.pallas_call(
            kernel,
            out_shape=jax.ShapeDtypeStruct((n_splits * _SUBLANES, _LANES), jnp.float32),
            grid_spec=pltpu.PrefetchScalarGridSpec(
                num_scalar_prefetch=0,
                grid=(n_splits, blocks_per_split),
                in_specs=[
                    pl.BlockSpec((blk_rows, _LANES), in_map),
                    pl.BlockSpec((blk_rows, _LANES), in_map),
                ],
                out_specs=pl.BlockSpec((_SUBLANES, _LANES), out_map),
            ),
            compiler_params=pltpu.CompilerParams(
                dimension_semantics=("parallel", "arbitrary"),
            ),
            cost_estimate=cost,
        )(a2, b2)

        # Single tiny cross-lane reduction outside the kernel.
        main_sum = jnp.sum(partials)

    tail_sum = jnp.float32(0.0)
    if tail:
        ta = a[rows * _LANES:].astype(jnp.float32)
        tb = b[rows * _LANES:].astype(jnp.float32)
        tail_sum = jnp.sum((ta - tb) ** 2)

    loss = (main_sum + tail_sum) / jnp.float32(n)
    return {"loss": loss}


if __name__ == "__main__":
    key = jax.random.PRNGKey(0)
    keys = jax.random.split(key, 8)

    # Aligned NCHW-like reconstruction-loss inputs (numel % 128 == 0).
    l_hat = jax.random.normal(keys[0], (2, 4, 16, 16), dtype=jnp.float32)
    l = jax.random.normal(keys[1], (2, 4, 16, 16), dtype=jnp.float32)
    out = self_supervised_estimator_loss(l_hat, l)
    loss = jax.block_until_ready(out["loss"])
    ref = jnp.mean((l_hat - l) ** 2)
    assert jnp.allclose(loss, ref, rtol=1e-5, atol=1e-6), (loss, ref)

    # Ragged case (numel % 128 != 0): aligned prefix through the kernel
    # (masked last block), <128-element tail folded in the wrapper.
    l_hat2 = jax.random.normal(keys[2], (3, 5, 17, 13), dtype=jnp.float32)
    l2 = jax.random.normal(keys[3], (3, 5, 17, 13), dtype=jnp.float32)
    out2 = self_supervised_estimator_loss(l_hat2, l2)
    loss2 = jax.block_until_ready(out2["loss"])
    ref2 = jnp.mean((l_hat2 - l2) ** 2)
    assert jnp.allclose(loss2, ref2, rtol=1e-5, atol=1e-6), (loss2, ref2)

    # bf16 inputs: exercises the 16-row packed-sublane alignment + f32 cast.
    l_hat3 = jax.random.normal(keys[4], (2, 4, 16, 16), dtype=jnp.bfloat16)
    l3 = jax.random.normal(keys[5], (2, 4, 16, 16), dtype=jnp.bfloat16)
    out3 = self_supervised_estimator_loss(l_hat3, l3)
    loss3 = jax.block_until_ready(out3["loss"])
    ref3 = jnp.mean((l_hat3.astype(jnp.float32) - l3.astype(jnp.float32)) ** 2)
    assert jnp.allclose(loss3, ref3, rtol=1e-5, atol=1e-6), (loss3, ref3)

    # Tiny input (< 128 elems): wrapper-only path.
    l_hat4 = jax.random.normal(keys[6], (3, 7), dtype=jnp.float32)
    l4 = jax.random.normal(keys[7], (3, 7), dtype=jnp.float32)
    out4 = self_supervised_estimator_loss(l_hat4, l4)
    loss4 = jax.block_until_ready(out4["loss"])
    ref4 = jnp.mean((l_hat4 - l4) ** 2)
    assert jnp.allclose(loss4, ref4, rtol=1e-5, atol=1e-6), (loss4, ref4)

    print("KERNEL_OK")
</pallas_src>

<mosaic_0001>
module attributes {stable_mosaic.version = 11 : i64} {
  func.func @_mse_partial_kernel(%arg0: i32, %arg1: i32, %arg2: memref<16x128xf32, #tpu.memory_space<vmem>>, %arg3: memref<16x128xf32, #tpu.memory_space<vmem>>, %arg4: memref<8x128xf32, #tpu.memory_space<vmem>>) attributes {dimension_semantics = [#tpu.dimension_semantics<parallel>, #tpu.dimension_semantics<arbitrary>], iteration_bounds = array<i64: 1, 1>, scalar_prefetch = 0 : i64, scratch_operands = 0 : i64, tpu.core_type = #tpu.core_type<tc>, window_params = [{transform_indices = @transform_0, window_bounds = array<i64: 16, 128>}, {transform_indices = @transform_1, window_bounds = array<i64: 16, 128>}, {transform_indices = @transform_2, window_bounds = array<i64: 8, 128>}]} {
    %c0_i32 = arith.constant 0 : i32
    %0 = arith.cmpi eq, %arg1, %c0_i32 : i32
    %1 = arith.extui %0 : i1 to i32
    %c0_i32_0 = arith.constant 0 : i32
    %2 = arith.cmpi ne, %1, %c0_i32_0 : i32
    scf.if %2 {
      %cst = arith.constant 0.000000e+00 : f32
      %17 = vector.broadcast %cst : f32 to vector<8x128xf32>
      %c0_8 = arith.constant 0 : index
      %c0_9 = arith.constant 0 : index
      %18 = vector.load %arg4[%c0_8, %c0_9] : memref<8x128xf32, #tpu.memory_space<vmem>>, vector<8x128xf32>
      tpu.vector_store %arg4[%c0_8, %c0_9], %17 {strides = array<i32>} : memref<8x128xf32, #tpu.memory_space<vmem>>, vector<8x128xf32>,
    } else {
    }
    %c0 = arith.constant 0 : index
    %c0_1 = arith.constant 0 : index
    %3 = vector.load %arg2[%c0, %c0_1] : memref<16x128xf32, #tpu.memory_space<vmem>>, vector<16x128xf32>
    %c0_2 = arith.constant 0 : index
    %c0_3 = arith.constant 0 : index
    %4 = vector.load %arg3[%c0_2, %c0_3] : memref<16x128xf32, #tpu.memory_space<vmem>>, vector<16x128xf32>
    %5 = arith.subf %3, %4 : vector<16x128xf32>
    %6 = arith.mulf %5, %5 : vector<16x128xf32>
    %c1_i32 = arith.constant 1 : i32
    %7 = arith.muli %arg0, %c1_i32 : i32
    %8 = arith.addi %7, %arg1 : i32
    %c16_i32 = arith.constant 16 : i32
    %9 = arith.muli %8, %c16_i32 : i32
    %c16_i32_4 = arith.constant 16 : i32
    %10 = arith.addi %9, %c16_i32_4 : i32
    %c16_i32_5 = arith.constant 16 : i32
    %11 = arith.cmpi sle, %10, %c16_i32_5 : i32
    %12 = arith.extui %11 : i1 to i32
    %c0_i32_6 = arith.constant 0 : i32
    %13 = arith.cmpi ne, %12, %c0_i32_6 : i32
    scf.if %13 {
      %c0_8 = arith.constant 0 : index
      %c0_9 = arith.constant 0 : index
      %17 = vector.load %arg4[%c0_8, %c0_9] : memref<8x128xf32, #tpu.memory_space<vmem>>, vector<8x128xf32>
      %18 = vector.shape_cast %6 : vector<16x128xf32> to vector<2x8x128xf32>
      %cst = arith.constant dense<0.000000e+00> : vector<8x128xf32>
      %19 = vector.multi_reduction <add>, %18, %cst [0] : vector<2x8x128xf32> to vector<8x128xf32>
      %20 = arith.addf %17, %19 : vector<8x128xf32>
      %c0_10 = arith.constant 0 : index
      %c0_11 = arith.constant 0 : index
      %21 = vector.load %arg4[%c0_10, %c0_11] : memref<8x128xf32, #tpu.memory_space<vmem>>, vector<8x128xf32>
      tpu.vector_store %arg4[%c0_10, %c0_11], %20 {strides = array<i32>} : memref<8x128xf32, #tpu.memory_space<vmem>>, vector<8x128xf32>,
    } else {
    }
    %true = arith.constant true
    %14 = arith.xori %11, %true : i1
    %15 = arith.extui %14 : i1 to i32
    %c0_i32_7 = arith.constant 0 : i32
    %16 = arith.cmpi ne, %15, %c0_i32_7 : i32
    scf.if %16 {
      %17 = tpu.iota {dimensions = array<i32: 0>} : vector<16x128xi32>
      %18 = vector.broadcast %9 : i32 to vector<16x128xi32>
      %19 = arith.addi %18, %17 : vector<16x128xi32>
      %c16_i32_8 = arith.constant 16 : i32
      %20 = vector.broadcast %c16_i32_8 : i32 to vector<16x128xi32>
      %21 = arith.cmpi slt, %19, %20 : vector<16x128xi32>
      %cst = arith.constant 0.000000e+00 : f32
      %22 = vector.broadcast %cst : f32 to vector<16x128xf32>
      %23 = arith.select %21, %6, %22 : vector<16x128xi1>, vector<16x128xf32>
      %c0_9 = arith.constant 0 : index
      %c0_10 = arith.constant 0 : index
      %24 = vector.load %arg4[%c0_9, %c0_10] : memref<8x128xf32, #tpu.memory_space<vmem>>, vector<8x128xf32>
      %25 = vector.shape_cast %23 : vector<16x128xf32> to vector<2x8x128xf32>
      %cst_11 = arith.constant dense<0.000000e+00> : vector<8x128xf32>
      %26 = vector.multi_reduction <add>, %25, %cst_11 [0] : vector<2x8x128xf32> to vector<8x128xf32>
      %27 = arith.addf %24, %26 : vector<8x128xf32>
      %c0_12 = arith.constant 0 : index
      %c0_13 = arith.constant 0 : index
      %28 = vector.load %arg4[%c0_12, %c0_13] : memref<8x128xf32, #tpu.memory_space<vmem>>, vector<8x128xf32>
      tpu.vector_store %arg4[%c0_12, %c0_13], %27 {strides = array<i32>} : memref<8x128xf32, #tpu.memory_space<vmem>>, vector<8x128xf32>,
    } else {
    }
    return
  }
  func.func @transform_0(%arg0: i32, %arg1: i32) -> (i32, i32) {
    %c1_i32 = arith.constant 1 : i32
    %0 = arith.muli %arg0, %c1_i32 : i32
    %1 = arith.addi %0, %arg1 : i32
    %c0_i32 = arith.constant 0 : i32
    %2 = arith.minsi %1, %c0_i32 : i32
    %c0_i32_0 = arith.constant 0 : i32
    %c0_i32_1 = arith.constant 0 : i32
    return %2, %c0_i32_0 : i32, i32
  }
  func.func @transform_1(%arg0: i32, %arg1: i32) -> (i32, i32) {
    %c1_i32 = arith.constant 1 : i32
    %0 = arith.muli %arg0, %c1_i32 : i32
    %1 = arith.addi %0, %arg1 : i32
    %c0_i32 = arith.constant 0 : i32
    %2 = arith.minsi %1, %c0_i32 : i32
    %c0_i32_0 = arith.constant 0 : i32
    %c0_i32_1 = arith.constant 0 : i32
    return %2, %c0_i32_0 : i32, i32
  }
  func.func @transform_2(%arg0: i32, %arg1: i32) -> (i32, i32) {
    %c0_i32 = arith.constant 0 : i32
    %c0_i32_0 = arith.constant 0 : i32
    return %arg0, %c0_i32 : i32, i32
  }
}

</mosaic_0001>

<bundles_post_ra>
// kernel: tpu_custom_call.1
= control target key start
LH: loop header
LB: loop body
LE: loop exit
PB: predicated region body
PF: predicated region fallthrough
CT: control target
= control target key end

     0   :  { %7 = vsyncpa [#allocation3], 0  ;;  %s223_s0 = inlined_call_operand.hbm [shape: f32[16,128], index: 0, kind: input, shape index: {}]   ;;  %s224_s1 = inlined_call_operand.hbm [shape: f32[16,128], index: 1, kind: input, shape index: {}]   ;;  %s225_s2 = inlined_call_operand.hbm [shape: f32[8,128], index: 2, kind: output, shape index: {}]  }
   0x1   :  { %8 = vsyncpa [#allocation6], 0 }
   0x2   :  { %9 = vsyncpa [#allocation4], 0  ;;  %s194_s9 = smov [#allocation2]  }
   0x3   :  { %s21_s10 = sshll.u32 %s194_s9, 4  ;;  %s22_s10 = int_to_ptr.vmem [resolvable:$true] %s21_s10 }
   0x4   :  { %s136_s11 = scalar_lea.vmem %s22_s10, 256  ;;  %p141_p1 = scmp.lt.s32.totalorder %s22_s10, %s22_s10 }
   0x5   :  { %p137_p0 = scmp.ne.s32.totalorder %s22_s10, %s136_s11  ;;  %p142_p2 = scmp.lt.s32.totalorder %s136_s11, %s136_s11 }
   0x7   :  { %p143_p3 = por %p142_p2, %p141_p1 }
   0x9   :  { %p144_p4 = pnand %p143_p3, %p137_p0 }
   0xb   :  { %147 = shalt.err (!%p144_p4)
}
   0xc   :  { %s195_s12 = smov 128   ;;  %s196_s13 = smov 8  }
   0xd   :  { %27 = dma.hbm_to_vmem [thread:$0]  %s223_s0, 256, %s22_s10, [#allocation3], %s195_s12, %s195_s12, %s196_s13  }
   0xe   :  { %s197_s16 = smov [#allocation5]  }
   0xf   :  { %s39_s17 = sshll.u32 %s197_s16, 4  ;;  %s40_s17 = int_to_ptr.vmem [resolvable:$true] %s39_s17 }
  0x10   :  { %s156_s18 = scalar_lea.vmem %s40_s17, 256  ;;  %p161_p6 = scmp.lt.s32.totalorder %s40_s17, %s40_s17 }
  0x11   :  { %p157_p5 = scmp.ne.s32.totalorder %s40_s17, %s156_s18  ;;  %p162_p7 = scmp.lt.s32.totalorder %s156_s18, %s156_s18 }
  0x13   :  { %p163_p8 = por %p162_p7, %p161_p6 }
  0x15   :  { %p164_p9 = pnand %p163_p8, %p157_p5 }
  0x17   :  { %167 = shalt.err (!%p164_p9)
}
  0x18   :  { %45 = dma.hbm_to_vmem [thread:$0]  %s224_s1, 256, %s40_s17, [#allocation6], %s195_s12, %s195_s12, %s196_s13  }
  0x19   :  { %188 = dma.done.wait [#allocation3], 256  }
  0x1a   :  { %189 = vsyncadd [#allocation3], 4294967040 }
  0x1b   :  { %190 = dma.done.wait [#allocation6], 256  }
  0x1c   :  { %191 = vsyncadd [#allocation6], 4294967040  ;;  %v65_v0 = vld [vmem:[#allocation2] sm:$0xff]  ;;  %v66_v1 = vld [vmem:[#allocation2 + $0x8] sm:$0xff]  ;;  %s198_s0 = smov [#allocation7]  }
  0x1d   :  { %v67_v2 = vld [vmem:[#allocation5] sm:$0xff]  ;;  %v68_v3 = vld [vmem:[#allocation5 + $0x8] sm:$0xff]  ;;  %s108_s21 = sshll.u32 %s198_s0, 4  ;;  %s109_s21 = int_to_ptr.vmem [resolvable:$true] %s108_s21 }
  0x1e   :  { %v69_v4 = vsub.f32 %v65_v0, %v67_v2  ;;  %v70_v5 = vsub.f32 %v66_v1, %v68_v3  ;;  %s168_s22 = scalar_lea.vmem %s109_s21, 128  ;;  %p173_p11 = scmp.lt.s32.totalorder %s109_s21, %s109_s21 }
  0x1f   :  { %p169_p10 = scmp.ne.s32.totalorder %s109_s21, %s168_s22  ;;  %p174_p12 = scmp.lt.s32.totalorder %s168_s22, %s168_s22 }
  0x20   :  { %v71_v6 = vmul.f32 %v69_v4, %v69_v4  ;;  %v72_v7 = vmul.f32 %v70_v5, %v70_v5 }
  0x21   :  { %p175_p13 = por %p174_p12, %p173_p11 }
  0x22   :  { %v81_v8 = vadd.f32 %v72_v7, %v71_v6 }
  0x23   :  { %p176_p0 = pnand %p175_p13, %p169_p10 }
  0x24   :  { %83 = vst [vmem:[#allocation7] sm:$0xff] %v81_v8 }
  0x25   :  { %179 = shalt.err (!%p176_p0)
}
  0x26   :  { %111 = dma.vmem_to_hbm [thread:$0]  %s109_s21, 128, %s225_s2, [#allocation4]  }
  0x27   :  { %192 = dma.done.wait [#allocation4], 128  }
  0x28   :  { %193 = vsyncadd [#allocation4], 4294967168 }
  0x29   :  { %115 = vsyncpa [#allocation3], 1 }
  0x2a   :  { %116 = vsyncpa [#allocation6], 1 }
  0x2b   :  { %117 = vsyncpa [#allocation4], 1 }

</bundles_post_ra>
